<compile_context>
chip_gen: v5e
topology: v5e:2x2
jax: 0.10.0
libtpu: 0.0.40
codegen_flags: <defaults>
</compile_context>

<pallas_src>
import functools

import jax
import jax.numpy as jnp
from jax.experimental import pallas as pl
from jax.experimental.pallas import tpu as pltpu

LANE = 128


def _round_up(x, m):
    return (x + m - 1) // m * m


def _mlp_kernel(n_layers, pf, activation, x_ref, p_ref, o_ref):
    """Whole MLP forward, fully resident in VMEM.

    x_ref: (TB, PF)            zero-padded input block.
    p_ref: (n_layers, PF+8, PF) parameter slab; per layer, rows [0:PF] hold W
                               (stored [in, out] so h @ W == PyTorch x @ W^T),
                               row PF holds the bias, rows PF+1..PF+7 are pad.
    o_ref: (TB, PF)            lane-dense output block (cols >= output_dim = 0).
    """

    def act(h):
        if activation == "relu":
            return jnp.maximum(h, 0.0)
        elif activation == "tanh":
            return jnp.tanh(h)  # routed to the EUP slot
        raise ValueError(activation)

    h = x_ref[...]
    # Short, fixed trip-count layer loop: keep it unrolled at trace time.
    for i in range(n_layers):
        blk = p_ref[i]                    # one (PF+8, PF) load per layer
        w = blk[:pf, :]
        b = blk[pf:pf + 1, :]
        h = jnp.dot(h.astype(w.dtype), w, preferred_element_type=jnp.float32)
        h = h + b.astype(jnp.float32)
        if i < n_layers - 1:
            h = act(h)
    o_ref[...] = h


def init_params(key, input_dim, output_dim, hidden_size, hidden_layers):
    """PyTorch nn.Linear default init: U(-1/sqrt(fan_in), 1/sqrt(fan_in)).

    Weights are stored as [in_features, out_features] so the kernel computes
    h @ W + b (equivalent to PyTorch's y = x @ W^T + b).
    """
    dims = [input_dim] + [hidden_size] * hidden_layers + [output_dim]
    params = []
    for fan_in, fan_out in zip(dims[:-1], dims[1:]):
        key, kw, kb = jax.random.split(key, 3)
        bound = 1.0 / jnp.sqrt(jnp.float32(fan_in))
        w = jax.random.uniform(kw, (fan_in, fan_out), jnp.float32, -bound, bound)
        b = jax.random.uniform(kb, (fan_out,), jnp.float32, -bound, bound)
        params.append((w, b))
    return params


def _pack_params(params, pf, dtype):
    """Pack all (W, b) into one zero-padded slab of shape (L, pf + 8, pf)."""
    n_layers = len(params)
    slab = jnp.zeros((n_layers, pf + 8, pf), dtype)
    for i, (w, b) in enumerate(params):
        fin, fout = w.shape
        slab = slab.at[i, :fin, :fout].set(w.astype(dtype))
        slab = slab.at[i, pf, :fout].set(b.reshape(-1).astype(dtype))
    return slab


def neural_network_forward(s, params, activation, *, block_batch=128,
                           param_dtype=jnp.float32):
    """s: [batch, input_dim] float32. params: list of (W [in,out], b [out])."""
    batch, input_dim = s.shape
    output_dim = params[-1][0].shape[1]
    n_layers = len(params)

    # Pad every feature dim to a lane-dense width (single PF for all layers).
    pf = _round_up(max([input_dim] + [w.shape[1] for (w, _) in params]), LANE)

    # One consolidated parameter slab (resident across all grid steps).
    # On v6e/v7x, param_dtype=jnp.bfloat16 halves DMA/VMEM and uses the native
    # bf16 MXU path while keeping fp32 accumulation.
    slab = _pack_params(params, pf, param_dtype)

    # Batch tiling: big lane-dense blocks, batch padded to a tile multiple.
    tb = min(block_batch, _round_up(batch, 8))
    bp = _round_up(batch, tb)
    x_pad = jnp.zeros((bp, pf), jnp.float32).at[:batch, :input_dim].set(s)

    grid = (bp // tb,)
    out = pl.pallas_call(
        functools.partial(_mlp_kernel, n_layers, pf, activation),
        out_shape=jax.ShapeDtypeStruct((bp, pf), jnp.float32),
        grid=grid,
        in_specs=[
            pl.BlockSpec((tb, pf), lambda i: (i, 0)),                   # x tile
            pl.BlockSpec((n_layers, pf + 8, pf), lambda i: (0, 0, 0)),  # params (resident)
        ],
        out_specs=pl.BlockSpec((tb, pf), lambda i: (i, 0)),             # lane-dense out
        compiler_params=pltpu.CompilerParams(
            dimension_semantics=("parallel",)),
    )(x_pad, slab)

    return out[:batch, :output_dim]


if __name__ == "__main__":
    # MLP policy/critic shapes; batch >= 128 so the grid + MXU get real work.
    batch = 256
    input_dim = 4
    output_dim = 2
    hidden_size = 32
    hidden_layers = 3
    activation = "relu"

    key = jax.random.PRNGKey(0)
    key, kx = jax.random.split(key)
    x = jax.random.normal(kx, (batch, input_dim), jnp.float32)

    params = init_params(key, input_dim, output_dim, hidden_size, hidden_layers)

    out = neural_network_forward(x, params, activation)
    out = jax.block_until_ready(out)

    # Pure-JAX reference check (PyTorch-equivalent forward).
    h = x
    for w, b in params[:-1]:
        h = jnp.maximum(h @ w + b, 0.0)
    ref = h @ params[-1][0] + params[-1][1]
    assert out.shape == (batch, output_dim)
    assert jnp.allclose(out, ref, atol=1e-5, rtol=1e-5)

    print("KERNEL_OK")
</pallas_src>

<mosaic_0001>
module attributes {stable_mosaic.version = 11 : i64} {
  func.func @_mlp_kernel(%arg0: i32, %arg1: memref<128x128xf32, #tpu.memory_space<vmem>>, %arg2: memref<4x136x128xf32, #tpu.memory_space<vmem>>, %arg3: memref<128x128xf32, #tpu.memory_space<vmem>>) attributes {dimension_semantics = [#tpu.dimension_semantics<parallel>], iteration_bounds = array<i64: 2>, scalar_prefetch = 0 : i64, scratch_operands = 0 : i64, tpu.core_type = #tpu.core_type<tc>, window_params = [{transform_indices = @transform_0, window_bounds = array<i64: 128, 128>}, {pipeline_mode = #tpu.pipeline_mode<synchronous>, transform_indices = @transform_1, window_bounds = array<i64: 4, 136, 128>}, {transform_indices = @transform_2, window_bounds = array<i64: 128, 128>}]} {
    %c0 = arith.constant 0 : index
    %c0_0 = arith.constant 0 : index
    %0 = vector.load %arg1[%c0, %c0_0] : memref<128x128xf32, #tpu.memory_space<vmem>>, vector<128x128xf32>
    %c0_1 = arith.constant 0 : index
    %c0_2 = arith.constant 0 : index
    %c0_3 = arith.constant 0 : index
    %1 = vector.load %arg2[%c0_1, %c0_2, %c0_3] : memref<4x136x128xf32, #tpu.memory_space<vmem>>, vector<1x136x128xf32>
    %2 = vector.shape_cast %1 : vector<1x136x128xf32> to vector<136x128xf32>
    %3 = vector.extract_strided_slice %2 {offsets = [0, 0], sizes = [128, 128], strides = [1, 1]} : vector<136x128xf32> to vector<128x128xf32>
    %4 = vector.extract_strided_slice %2 {offsets = [128, 0], sizes = [1, 128], strides = [1, 1]} : vector<136x128xf32> to vector<1x128xf32>
    %cst = arith.constant dense<0.000000e+00> : vector<128x128xf32>
    %5 = tpu.matmul %0, %3, %cst {dimension_numbers = #tpu.dot_dimension_numbers<[1], [0], [0], [1], [0, 0, 1, 1], [], []>} : vector<128x128xf32>, vector<128x128xf32>, vector<128x128xf32> -> vector<128x128xf32>
    %6 = vector.broadcast %4 : vector<1x128xf32> to vector<128x128xf32>
    %7 = arith.addf %5, %6 : vector<128x128xf32>
    %cst_4 = arith.constant 0.000000e+00 : f32
    %8 = vector.broadcast %cst_4 : f32 to vector<128x128xf32>
    %9 = arith.maximumf %7, %8 : vector<128x128xf32>
    %c1 = arith.constant 1 : index
    %c0_5 = arith.constant 0 : index
    %c0_6 = arith.constant 0 : index
    %10 = vector.load %arg2[%c1, %c0_5, %c0_6] : memref<4x136x128xf32, #tpu.memory_space<vmem>>, vector<1x136x128xf32>
    %11 = vector.shape_cast %10 : vector<1x136x128xf32> to vector<136x128xf32>
    %12 = vector.extract_strided_slice %11 {offsets = [0, 0], sizes = [128, 128], strides = [1, 1]} : vector<136x128xf32> to vector<128x128xf32>
    %13 = vector.extract_strided_slice %11 {offsets = [128, 0], sizes = [1, 128], strides = [1, 1]} : vector<136x128xf32> to vector<1x128xf32>
    %cst_7 = arith.constant dense<0.000000e+00> : vector<128x128xf32>
    %14 = tpu.matmul %9, %12, %cst_7 {dimension_numbers = #tpu.dot_dimension_numbers<[1], [0], [0], [1], [0, 0, 1, 1], [], []>} : vector<128x128xf32>, vector<128x128xf32>, vector<128x128xf32> -> vector<128x128xf32>
    %15 = vector.broadcast %13 : vector<1x128xf32> to vector<128x128xf32>
    %16 = arith.addf %14, %15 : vector<128x128xf32>
    %cst_8 = arith.constant 0.000000e+00 : f32
    %17 = vector.broadcast %cst_8 : f32 to vector<128x128xf32>
    %18 = arith.maximumf %16, %17 : vector<128x128xf32>
    %c2 = arith.constant 2 : index
    %c0_9 = arith.constant 0 : index
    %c0_10 = arith.constant 0 : index
    %19 = vector.load %arg2[%c2, %c0_9, %c0_10] : memref<4x136x128xf32, #tpu.memory_space<vmem>>, vector<1x136x128xf32>
    %20 = vector.shape_cast %19 : vector<1x136x128xf32> to vector<136x128xf32>
    %21 = vector.extract_strided_slice %20 {offsets = [0, 0], sizes = [128, 128], strides = [1, 1]} : vector<136x128xf32> to vector<128x128xf32>
    %22 = vector.extract_strided_slice %20 {offsets = [128, 0], sizes = [1, 128], strides = [1, 1]} : vector<136x128xf32> to vector<1x128xf32>
    %cst_11 = arith.constant dense<0.000000e+00> : vector<128x128xf32>
    %23 = tpu.matmul %18, %21, %cst_11 {dimension_numbers = #tpu.dot_dimension_numbers<[1], [0], [0], [1], [0, 0, 1, 1], [], []>} : vector<128x128xf32>, vector<128x128xf32>, vector<128x128xf32> -> vector<128x128xf32>
    %24 = vector.broadcast %22 : vector<1x128xf32> to vector<128x128xf32>
    %25 = arith.addf %23, %24 : vector<128x128xf32>
    %cst_12 = arith.constant 0.000000e+00 : f32
    %26 = vector.broadcast %cst_12 : f32 to vector<128x128xf32>
    %27 = arith.maximumf %25, %26 : vector<128x128xf32>
    %c3 = arith.constant 3 : index
    %c0_13 = arith.constant 0 : index
    %c0_14 = arith.constant 0 : index
    %28 = vector.load %arg2[%c3, %c0_13, %c0_14] : memref<4x136x128xf32, #tpu.memory_space<vmem>>, vector<1x136x128xf32>
    %29 = vector.shape_cast %28 : vector<1x136x128xf32> to vector<136x128xf32>
    %30 = vector.extract_strided_slice %29 {offsets = [0, 0], sizes = [128, 128], strides = [1, 1]} : vector<136x128xf32> to vector<128x128xf32>
    %31 = vector.extract_strided_slice %29 {offsets = [128, 0], sizes = [1, 128], strides = [1, 1]} : vector<136x128xf32> to vector<1x128xf32>
    %cst_15 = arith.constant dense<0.000000e+00> : vector<128x128xf32>
    %32 = tpu.matmul %27, %30, %cst_15 {dimension_numbers = #tpu.dot_dimension_numbers<[1], [0], [0], [1], [0, 0, 1, 1], [], []>} : vector<128x128xf32>, vector<128x128xf32>, vector<128x128xf32> -> vector<128x128xf32>
    %33 = vector.broadcast %31 : vector<1x128xf32> to vector<128x128xf32>
    %34 = arith.addf %32, %33 : vector<128x128xf32>
    %c0_16 = arith.constant 0 : index
    %c0_17 = arith.constant 0 : index
    %35 = vector.load %arg3[%c0_16, %c0_17] : memref<128x128xf32, #tpu.memory_space<vmem>>, vector<128x128xf32>
    tpu.vector_store %arg3[%c0_16, %c0_17], %34 {strides = array<i32>} : memref<128x128xf32, #tpu.memory_space<vmem>>, vector<128x128xf32>,
    return
  }
  func.func @transform_0(%arg0: i32) -> (i32, i32) {
    %c0_i32 = arith.constant 0 : i32
    %c0_i32_0 = arith.constant 0 : i32
    return %arg0, %c0_i32 : i32, i32
  }
  func.func @transform_1(%arg0: i32) -> (i32, i32, i32) {
    %c0_i32 = arith.constant 0 : i32
    %c0_i32_0 = arith.constant 0 : i32
    %c0_i32_1 = arith.constant 0 : i32
    %c0_i32_2 = arith.constant 0 : i32
    return %c0_i32, %c0_i32_0, %c0_i32_1 : i32, i32, i32
  }
  func.func @transform_2(%arg0: i32) -> (i32, i32) {
    %c0_i32 = arith.constant 0 : i32
    %c0_i32_0 = arith.constant 0 : i32
    return %arg0, %c0_i32 : i32, i32
  }
}

</mosaic_0001>

<bundles_post_ra>
// kernel: tpu_custom_call.1
= control target key start
LH: loop header
LB: loop body
LE: loop exit
PB: predicated region body
PF: predicated region fallthrough
CT: control target
= control target key end

     0   :  { %7 = vsyncpa [#allocation3], 0  ;;  %s1149_s0 = inlined_call_operand.hbm [shape: f32[256,128], index: 0, kind: input, shape index: {}]   ;;  %s1150_s1 = inlined_call_operand.hbm [shape: f32[4,136,128], index: 1, kind: input, shape index: {}]   ;;  %s1151_s2 = inlined_call_operand.hbm [shape: f32[256,128], index: 2, kind: output, shape index: {}]  }
   0x1   :  { %9 = vsyncpa [#allocation3 + $0x1], 0 }
   0x2   :  { %10 = vsyncpa [#allocation6], 0 }
   0x3   :  { %11 = vsyncpa [#allocation4], 0 }
   0x4   :  { %13 = vsyncpa [#allocation4 + $0x1], 0  ;;  %s928_s9 = smov 0   ;;  %s930_s10 = smov 0  }
   0x5   :  { %s932_s11 = smov 0   ;;  %s934_s12 = smov 0  }
   0x6 LB: > { %s949_s13 = sadd.s32 4294967295, %s906_s12   ;;  %s697_s14 = sadd.s32 4294967294, %s906_s12   ;;  %s906_s12 = sphi %s934_s12, %s1161_s12   ;;  %s902_s11 = sphi %s932_s11, %s1160_s11   ;;  %s898_s10 = sphi %s930_s10, %s1159_s10   ;;  %s894_s9 = sphi %s928_s9, %s1158_s9  }
   0x7   : > { %p39_p0 = scmp.ne.s32.totalorder %s898_s10, %s894_s9  ;;  %p40_p1 = scmp.eq.s32.totalorder %s949_s13, 0 }
   0x8   : > { %p84_p2 = scmp.eq.s32.totalorder %s949_s13, 1  ;;  %p90_p3 = scmp.eq.s32.totalorder %s697_s14, 1 }
   0x9   : > { %p958_p4 = por %p40_p1, %p39_p0  ;;  %p698_p5 = scmp.ge.s32.totalorder %s906_s12, 1 }
   0xa   : > { %p963_p6 = por %p90_p3, %p39_p0  ;;  %p97_p7 = scmp.lt.s32.totalorder %s906_s12, 3 }
   0xb   : > { %s108_s19 = sshll.u32 %s1150_s1, 4  ;;  %s908_s21 = smov [#allocation5]   ;;  %s109_s19 = int_to_ptr.hbm [resolvable:$true] %s108_s19 }
   0xc   : > { %p971_p8 = pnand %p698_p5, %p97_p7  ;;  %s110_s22 = sshll.u32 %s908_s21, 4  ;;  %s111_s22 = int_to_ptr.vmem [resolvable:$true] %s110_s22 }
   0xd   : > { %s981_s23 = sadd.s32 1, %s906_s12   ;;  %s909_s24 = smov 128  }
   0xe   : > { %p723_p9 = pneg %p971_p8  ;;  %s910_s25 = smov 8  }
   0xf   : > { %s23_s26 = ssub.s32 %s906_s12, %s981_s23  ;;  %s26_s27 = sadd.s32 1, %s902_s11 }
  0x10   : > { %p724_p10 = pnand %p723_p9, %p40_p1  ;;  %p24_p12 = scmp.eq.s32.totalorder %s23_s26, 0 }
  0x11   : > { %p33_p13 = scmp.ne.s32.totalorder %s902_s11, %s898_s10  ;;  %p34_p0 = scmp.eq.s32.totalorder %s906_s12, 0 }
  0x12   : > { %726 = dma.hbm_to_vmem [thread:$0]  (!%p724_p10), %s109_s19, 8704, %s111_s22, [#allocation6], %s909_s24, %s909_s24, %s910_s25  }
  0x13   : > { %s993_s28 = scalar_select %p24_p12, %s902_s11, %s26_s27  }
  0x14   : > { %p997_p3 = por %p84_p2, %p33_p13  ;;  %p736_p5 = scmp.lt.s32.totalorder %s906_s12, 2 }
  0x15   : > { %s124_s30 = sand.u32 1, %s902_s11   ;;  %s713_s3 = sshll.u32 %s906_s12, 7 }
  0x16   : > { %p35_p7 = por %p34_p0, %p33_p13  ;;  %s701_s4 = sshll.u32 %s124_s30, 7 }
  0x17   : > { %s133_s7 = scalar_lea.hbm %s1149_s0, %s713_s3  ;;  %s128_s14 = scalar_lea.vmem [#allocation2], %s701_s4 }
  0x18   : > { %s134_s8 = sshll.u32 %s133_s7, 4  ;;  %s136_s17 = sshll.u32 %s128_s14, 4  ;;  %s135_s8 = int_to_ptr.hbm [resolvable:$true] %s134_s8  ;;  %s137_s17 = int_to_ptr.vmem [resolvable:$true] %s136_s17 }
  0x19   : > { %p1007_p9 = pnand %p736_p5, %p35_p7  ;;  %s125_s19 = scalar_lea.sflag [#allocation3], %s124_s30 }
  0x1a   : > { %s806_s21 = sshra.s32 %s135_s8, 4  ;;  %s813_s3 = scalar_lea.hbm %s1149_s0, 256  ;;  %s807_s21 = int_to_ptr.hbm [resolvable:$true] %s806_s21 }
  0x1b   : > { %s808_s22 = scalar_lea.hbm %s807_s21, 128  ;;  %p810_p10 = pneg %p1007_p9 }
  0x1c   : > { %p809_p2 = scmp.ne.s32.totalorder %s807_s21, %s808_s22  ;;  %p814_p0 = scmp.lt.s32.totalorder %s807_s21, %s1149_s0 }
  0x1d   : > { %p815_p5 = scmp.lt.s32.totalorder %s813_s3, %s808_s22 }
  0x1e   : > { %p811_p12 = pnand %p810_p10, %p809_p2 }
  0x1f   : > { %p816_p7 = por %p815_p5, %p814_p0 }
  0x20   : > { %p812_p13 = pneg %p811_p12 }
  0x22   : > { %p817_p11 = pnand %p816_p7, %p812_p13 }
  0x24   : > { %820 = shalt.err (!%p817_p11)
}
  0x25   : > { %730 = dma.hbm_to_vmem [thread:$0]  (!%p1007_p9), %s135_s8, 2048, %s137_s17, %s125_s19, %s909_s24, %s909_s24, %s910_s25  }
  0x26   : > { %148 = sbr.rel (%p971_p8) target bundleno = 732 (0x2dc), region = 28  ;;  %s1027_s30 = sand.u32 (!%p971_p8), 1, %s898_s10  }
  0x27   : > { %s705_s6 = sshll.u32 (!%p971_p8), %s1027_s30, 7  ;;  %s151_s7 = scalar_lea.sflag (!%p971_p8), [#allocation3], %s1027_s30 }
  0x28   : > { %s1033_s14 = scalar_lea.vmem (!%p971_p8), [#allocation2], %s705_s6 }
  0x2b   : > { %881 = dma.done.wait (%p958_p4), %s151_s7, 2048  }
  0x2c   : > { %883 = vsyncadd (%p958_p4), %s151_s7, 4294965248 }
  0x2d   : > { %885 = dma.done.wait (%p40_p1), [#allocation6], 8704  }
  0x2e   : > { %887 = vsyncadd (%p40_p1), [#allocation6], 4294958592  ;;  %v214_v0 = vld [vmem:[#allocation5 + $0x78] sm:$0xff]  ;;  %v213_v1 = vld [vmem:[#allocation5 + $0x70] sm:$0xff]  ;;  %s1097_s15 = scalar_lea.vmem [#allocation7], %s705_s6  ;;  %s714_s20 = sshll.u32 %s949_s13, 7 }
  0x2f   : > { %217 = vmatpush.msra.mxu0 %v214_v0  ;;  %v212_v2 = vld [vmem:[#allocation5 + $0x68] sm:$0xff]  ;;  %v211_v3 = vld [vmem:[#allocation5 + $0x60] sm:$0xff]  ;;  %v210_v4 = vld [vmem:[#allocation5 + $0x58] sm:$0xff]  ;;  %s610_s8 = scalar_lea.hbm %s1151_s2, %s714_s20  ;;  %s611_s17 = sshll.u32 %s1097_s15, 4  ;;  %s612_s17 = int_to_ptr.vmem [resolvable:$true] %s611_s17 }
  0x30   : > { %v209_v5 = vld [vmem:[#allocation5 + $0x50] sm:$0xff]  ;;  %v208_v6 = vld [vmem:[#allocation5 + $0x48] sm:$0xff]  ;;  %v207_v7 = vld [vmem:[#allocation5 + $0x40] sm:$0xff]  ;;  %s613_s18 = sshll.u32 %s610_s8, 4  ;;  %s599_s19 = scalar_lea.sflag [#allocation4], %s1027_s30  ;;  %s614_s18 = int_to_ptr.hbm [resolvable:$true] %s613_s18 }
  0x31   : > { %218 = vmatpush.msra.mxu0 %v213_v1  ;;  %v206_v8 = vld [vmem:[#allocation5 + $0x38] sm:$0xff]  ;;  %v205_v9 = vld [vmem:[#allocation5 + $0x30] sm:$0xff]  ;;  %v204_v10 = vld [vmem:[#allocation5 + $0x28] sm:$0xff]  ;;  %s850_s21 = sshra.s32 %s614_s18, 4  ;;  %s856_s27 = scalar_lea.hbm %s1151_s2, 256  ;;  %s851_s21 = int_to_ptr.hbm [resolvable:$true] %s850_s21 }
  0x32   : > { %v203_v11 = vld [vmem:[#allocation5 + $0x20] sm:$0xff]  ;;  %v202_v12 = vld [vmem:[#allocation5 + $0x18] sm:$0xff]  ;;  %v201_v13 = vld [vmem:[#allocation5 + $0x10] sm:$0xff]  ;;  %s852_s22 = scalar_lea.hbm %s851_s21, 128  ;;  %p857_p11 = scmp.lt.s32.totalorder %s851_s21, %s1151_s2 }
  0x33   : > { %219 = vmatpush.msra.mxu0 %v212_v2  ;;  %v200_v14 = vld [vmem:[#allocation5 + $0x8] sm:$0xff]  ;;  %v199_v15 = vld [vmem:[#allocation5] sm:$0xff]  ;;  %v185_v18 = vld [vmem:[%s1033_s14 + $0x10] sm:$0xff]  ;;  %p853_p1 = scmp.ne.s32.totalorder %s851_s21, %s852_s22  ;;  %p858_p9 = scmp.lt.s32.totalorder %s856_s27, %s852_s22 }
  0x34   : > { %v183_v16 = vld [vmem:[%s1033_s14] sm:$0xff]  ;;  %v184_v17 = vld [vmem:[%s1033_s14 + $0x8] sm:$0xff]  ;;  %v186_v19 = vld [vmem:[%s1033_s14 + $0x18] sm:$0xff] }
  0x35   : > { %220 = vmatpush.msra.mxu0 %v211_v3  ;;  %v187_v20 = vld [vmem:[%s1033_s14 + $0x20] sm:$0xff]  ;;  %v188_v21 = vld [vmem:[%s1033_s14 + $0x28] sm:$0xff]  ;;  %v189_v22 = vld [vmem:[%s1033_s14 + $0x30] sm:$0xff]  ;;  %p854_p4 = pnand %p853_p1, %p997_p3  ;;  %p859_p2 = por %p858_p9, %p857_p11 }
  0x36   : > { %v190_v23 = vld [vmem:[%s1033_s14 + $0x38] sm:$0xff]  ;;  %v191_v24 = vld [vmem:[%s1033_s14 + $0x40] sm:$0xff]  ;;  %v312_v27 = vld [vmem:[#allocation5 + $0xf0] sm:$0xff] }
  0x37   : > { %221 = vmatpush.msra.mxu0 %v210_v4  ;;  %v314_v25 = vld [vmem:[#allocation5 + $0x100] sm:$0xff]  ;;  %v313_v26 = vld [vmem:[#allocation5 + $0xf8] sm:$0xff]  ;;  %v192_v28 = vld [vmem:[%s1033_s14 + $0x48] sm:$0xff]  ;;  %p855_p8 = pneg %p854_p4 }
  0x38   : > { %317 = vmatpush.msra.mxu1 %v314_v25  ;;  %v311_v29 = vld [vmem:[#allocation5 + $0xe8] sm:$0xff]  ;;  %v310_v30 = vld [vmem:[#allocation5 + $0xe0] sm:$0xff]  ;;  %v309_v31 = vld [vmem:[#allocation5 + $0xd8] sm:$0xff] }
  0x39   : > { %222 = vmatpush.msra.mxu0 %v209_v5  ;;  %v308_v32 = vld [vmem:[#allocation5 + $0xd0] sm:$0xff]  ;;  %v307_v34 = vld [vmem:[#allocation5 + $0xc8] sm:$0xff]  ;;  %v306_v35 = vld [vmem:[#allocation5 + $0xc0] sm:$0xff]  ;;  %p860_p10 = pnand %p859_p2, %p855_p8 }
  0x3a   : > { %318 = vmatpush.msra.mxu1 %v313_v26  ;;  %v193_v33 = vld [vmem:[%s1033_s14 + $0x50] sm:$0xff]  ;;  %v305_v36 = vld [vmem:[#allocation5 + $0xb8] sm:$0xff]  ;;  %v303_v39 = vld [vmem:[#allocation5 + $0xa8] sm:$0xff] }
  0x3b   : > { %223 = vmatpush.msra.mxu0 %v208_v6  ;;  %v304_v37 = vld [vmem:[#allocation5 + $0xb0] sm:$0xff]  ;;  %v194_v38 = vld [vmem:[%s1033_s14 + $0x58] sm:$0xff]  ;;  %v302_v40 = vld [vmem:[#allocation5 + $0xa0] sm:$0xff] }
  0x3c   : > { %319 = vmatpush.msra.mxu1 %v312_v27  ;;  %v301_v41 = vld [vmem:[#allocation5 + $0x98] sm:$0xff]  ;;  %v195_v42 = vld [vmem:[%s1033_s14 + $0x60] sm:$0xff]  ;;  %v300_v43 = vld [vmem:[#allocation5 + $0x90] sm:$0xff] }
  0x3d   : > { %224 = vmatpush.msra.mxu0 %v207_v7  ;;  %v299_v44 = vld [vmem:[#allocation5 + $0x88] sm:$0xff]  ;;  %v197_v46 = vld [vmem:[%s1033_s14 + $0x70] sm:$0xff]  ;;  %v198_v47 = vld [vmem:[%s1033_s14 + $0x78] sm:$0xff] }
  0x3e   : > { %320 = vmatpush.msra.mxu1 %v311_v29  ;;  %v196_v45 = vld [vmem:[%s1033_s14 + $0x68] sm:$0xff]  ;;  %v215_v48 = vld [vmem:[#allocation5 + $0x80] sm:$0xff]  ;;  %v408_v25 = vld [vmem:[#allocation5 + $0x158] sm:$0xff] }
  0x3f   : > { %225 = vmatpush.msra.mxu0 %v206_v8  ;;  %v1059_v49 = vperm.slane %v215_v48, 0  ;;  %v407_v26 = vld [vmem:[#allocation5 + $0x150] sm:$0xff]  ;;  %v406_v27 = vld [vmem:[#allocation5 + $0x148] sm:$0xff] }
  0x40   : > { %321 = vmatpush.msra.mxu1 %v310_v30  ;;  %v405_v30 = vld [vmem:[#allocation5 + $0x140] sm:$0xff] }
  0x41   : > { %226 = vmatpush.msra.mxu0 %v205_v9 }
  0x42   : > { %322 = vmatpush.msra.mxu1 %v309_v31 }
  0x43   : > { %227 = vmatpush.msra.mxu0 %v204_v10 }
  0x44   : > { %323 = vmatpush.msra.mxu1 %v308_v32  ;;  %v404_v32 = vld [vmem:[#allocation5 + $0x138] sm:$0xff] }
  0x45   : > { %228 = vmatpush.msra.mxu0 %v203_v11 }
  0x46   : > { %324 = vmatpush.msra.mxu1 %v307_v34  ;;  %v402_v34 = vld [vmem:[#allocation5 + $0x128] sm:$0xff] }
  0x47   : > { %229 = vmatpush.msra.mxu0 %v202_v12 }
  0x48   : > { %325 = vmatpush.msra.mxu1 %v306_v35 }
  0x49   : > { %230 = vmatpush.msra.mxu0 %v201_v13  ;;  %v414_v13 = vld [vmem:[#allocation5 + $0x188] sm:$0xff] }
  0x4a   : > { %326 = vmatpush.msra.mxu1 %v305_v36  ;;  %417 = vmatpush.msra.mxu2 %v414_v13 }
  0x4b   : > { %231 = vmatpush.msra.mxu0 %v200_v14 }
  0x4c   : > { %327 = vmatpush.msra.mxu1 %v304_v37  ;;  %v401_v37 = vld [vmem:[#allocation5 + $0x120] sm:$0xff] }
  0x4d   : > { %232 = vmatpush.msra.mxu0 %v199_v15 }
  0x4e   : > { %233 = vmatmul.f32.vlgmr.msra.gmra.mxu0 %v183_v16  ;;  %328 = vmatpush.msra.mxu1 %v303_v39  ;;  %v413_v16 = vld [vmem:[#allocation5 + $0x180] sm:$0xff]  ;;  %v400_v39 = vld [vmem:[#allocation5 + $0x118] sm:$0xff] }
  0x4f   : > { %418 = vmatpush.msra.mxu2 %v413_v16 }
  0x50   : > { %329 = vmatpush.msra.mxu1 %v302_v40  ;;  %v399_v40 = vld [vmem:[#allocation5 + $0x110] sm:$0xff] }
  0x52   : > { %330 = vmatpush.msra.mxu1 %v301_v41 }
  0x54   : > { %331 = vmatpush.msra.mxu1 %v300_v43 }
  0x56   : > { %236 = vmatmul.f32.gmra.mxu0 %v184_v17  ;;  %332 = vmatpush.msra.mxu1 %v299_v44 }
  0x5e   : > { %239 = vmatmul.f32.gmra.mxu0 %v185_v18  ;;  %v412_v18 = vld [vmem:[#allocation5 + $0x178] sm:$0xff] }
  0x5f   : > { %419 = vmatpush.msra.mxu2 %v412_v18  ;;  %v514_v18 = vld [vmem:[#allocation5 + $0x210] sm:$0xff] }
  0x60   : > { %517 = vmatpush.msra.mxu3 %v514_v18 }
  0x66   : > { %242 = vmatmul.f32.gmra.mxu0 %v186_v19  ;;  %v411_v19 = vld [vmem:[#allocation5 + $0x170] sm:$0xff] }
  0x67   : > { %420 = vmatpush.msra.mxu2 %v411_v19  ;;  %v513_v19 = vld [vmem:[#allocation5 + $0x208] sm:$0xff] }
  0x68   : > { %518 = vmatpush.msra.mxu3 %v513_v19 }
  0x6e   : > { %245 = vmatmul.f32.gmra.mxu0 %v187_v20  ;;  %v410_v20 = vld [vmem:[#allocation5 + $0x168] sm:$0xff] }
  0x6f   : > { %421 = vmatpush.msra.mxu2 %v410_v20 }
  0x76   : > { %248 = vmatmul.f32.gmra.mxu0 %v188_v21 }
  0x7e   : > { %251 = vmatmul.f32.gmra.mxu0 %v189_v22 }
  0x86   : > { %254 = vmatmul.f32.gmra.mxu0 %v190_v23  ;;  %v409_v23 = vld [vmem:[#allocation5 + $0x160] sm:$0xff] }
  0x87   : > { %422 = vmatpush.msra.mxu2 %v409_v23 }
  0x89   : > { %423 = vmatpush.msra.mxu2 %v408_v25  ;;  %v510_v25 = vld [vmem:[#allocation5 + $0x1f0] sm:$0xff] }
  0x8b   : > { %424 = vmatpush.msra.mxu2 %v407_v26  ;;  %v509_v26 = vld [vmem:[#allocation5 + $0x1e8] sm:$0xff] }
  0x8d   : > { %425 = vmatpush.msra.mxu2 %v406_v27 }
  0x8e   : > { %257 = vmatmul.f32.gmra.mxu0 %v191_v24 }
  0x8f   : > { %426 = vmatpush.msra.mxu2 %v405_v30 }
  0x91   : > { %427 = vmatpush.msra.mxu2 %v404_v32  ;;  %v506_v32 = vld [vmem:[#allocation5 + $0x1d0] sm:$0xff] }
  0x96   : > { %260 = vmatmul.f32.gmra.mxu0 %v192_v28 }
  0x9e   : > { %263 = vmatmul.f32.gmra.mxu0 %v193_v33  ;;  %v403_v33 = vld [vmem:[#allocation5 + $0x130] sm:$0xff] }
  0x9f   : > { %428 = vmatpush.msra.mxu2 %v403_v33  ;;  %v505_v33 = vld [vmem:[#allocation5 + $0x1c8] sm:$0xff] }
  0xa1   : > { %429 = vmatpush.msra.mxu2 %v402_v34  ;;  %v504_v34 = vld [vmem:[#allocation5 + $0x1c0] sm:$0xff] }
  0xa3   : > { %430 = vmatpush.msra.mxu2 %v401_v37  ;;  %v503_v37 = vld [vmem:[#allocation5 + $0x1b8] sm:$0xff] }
  0xa5   : > { %431 = vmatpush.msra.mxu2 %v400_v39  ;;  %v502_v39 = vld [vmem:[#allocation5 + $0x1b0] sm:$0xff] }
  0xa6   : > { %266 = vmatmul.f32.gmra.mxu0 %v194_v38 }
  0xa7   : > { %432 = vmatpush.msra.mxu2 %v399_v40  ;;  %v501_v40 = vld [vmem:[#allocation5 + $0x1a8] sm:$0xff] }
  0xae   : > { %269 = vmatmul.f32.gmra.mxu0 %v195_v42 }
  0xb6   : > { %272 = vmatmul.f32.gmra.mxu0 %v196_v45 }
  0xbe   : > { %275 = vmatmul.f32.gmra.mxu0 %v197_v46 }
  0xc6   : > { %278 = vmatmul.f32.gmra.mxu0 %v198_v47 }
  0xcb   : > { %v234_v50 = vpop.f32.mrf.mxu0 }
  0xcc   : > { %v235_v51 = vadd.f32 %v234_v50, %v1059_v49 }
  0xce   : > { %v282_v52 = vmax.f32 %v235_v51, 0.0  ;;  %v315_v51 = vld [vmem:[#allocation5 + $0x108] sm:$0xff] }
  0xd0   : > { %333 = vmatmul.f32.vlgmr.msra.gmra.mxu1 %v282_v52  ;;  %v1077_v52 = vperm.slane %v315_v51, 0 }
  0xd3   : > { %v237_v53 = vpop.f32.mrf.mxu0 }
  0xd4   : > { %v238_v54 = vadd.f32 %v237_v53, %v1059_v49 }
  0xd6   : > { %v283_v55 = vmax.f32 %v238_v54, 0.0 }
  0xd8   : > { %336 = vmatmul.f32.gmra.mxu1 %v283_v55 }
  0xdb   : > { %v240_v56 = vpop.f32.mrf.mxu0 }
  0xdc   : > { %v241_v57 = vadd.f32 %v240_v56, %v1059_v49 }
  0xde   : > { %v284_v58 = vmax.f32 %v241_v57, 0.0 }
  0xe0   : > { %339 = vmatmul.f32.gmra.mxu1 %v284_v58 }
  0xe3   : > { %v243_v59 = vpop.f32.mrf.mxu0 }
  0xe4   : > { %v244_v60 = vadd.f32 %v243_v59, %v1059_v49 }
  0xe6   : > { %v285_v61 = vmax.f32 %v244_v60, 0.0 }
  0xe8   : > { %342 = vmatmul.f32.gmra.mxu1 %v285_v61 }
  0xeb   : > { %v246_v62 = vpop.f32.mrf.mxu0 }
  0xec   : > { %v247_v63 = vadd.f32 %v246_v62, %v1059_v49 }
  0xee   : > { %v286_v0 = vmax.f32 %v247_v63, 0.0 }
  0xf0   : > { %345 = vmatmul.f32.gmra.mxu1 %v286_v0 }
  0xf3   : > { %v249_v1 = vpop.f32.mrf.mxu0 }
  0xf4   : > { %v250_v2 = vadd.f32 %v249_v1, %v1059_v49 }
  0xf6   : > { %v287_v3 = vmax.f32 %v250_v2, 0.0 }
  0xf8   : > { %348 = vmatmul.f32.gmra.mxu1 %v287_v3 }
  0xfb   : > { %v252_v4 = vpop.f32.mrf.mxu0 }
  0xfc   : > { %v253_v5 = vadd.f32 %v252_v4, %v1059_v49 }
  0xfe   : > { %v288_v6 = vmax.f32 %v253_v5, 0.0 }
 0x100   : > { %351 = vmatmul.f32.gmra.mxu1 %v288_v6 }
 0x103   : > { %v255_v7 = vpop.f32.mrf.mxu0 }
 0x104   : > { %v256_v8 = vadd.f32 %v255_v7, %v1059_v49 }
 0x106   : > { %v289_v9 = vmax.f32 %v256_v8, 0.0 }
 0x108   : > { %354 = vmatmul.f32.gmra.mxu1 %v289_v9 }
 0x10b   : > { %v258_v10 = vpop.f32.mrf.mxu0 }
 0x10c   : > { %v259_v11 = vadd.f32 %v258_v10, %v1059_v49 }
 0x10e   : > { %v290_v12 = vmax.f32 %v259_v11, 0.0 }
 0x110   : > { %357 = vmatmul.f32.gmra.mxu1 %v290_v12 }
 0x113   : > { %v261_v14 = vpop.f32.mrf.mxu0 }
 0x114   : > { %v262_v15 = vadd.f32 %v261_v14, %v1059_v49 }
 0x116   : > { %v291_v17 = vmax.f32 %v262_v15, 0.0 }
 0x118   : > { %360 = vmatmul.f32.gmra.mxu1 %v291_v17 }
 0x11b   : > { %v264_v21 = vpop.f32.mrf.mxu0 }
 0x11c   : > { %v265_v22 = vadd.f32 %v264_v21, %v1059_v49 }
 0x11e   : > { %v292_v24 = vmax.f32 %v265_v22, 0.0  ;;  %v512_v22 = vld [vmem:[#allocation5 + $0x200] sm:$0xff] }
 0x11f   : > { %519 = vmatpush.msra.mxu3 %v512_v22 }
 0x120   : > { %363 = vmatmul.f32.gmra.mxu1 %v292_v24  ;;  %v511_v24 = vld [vmem:[#allocation5 + $0x1f8] sm:$0xff] }
 0x121   : > { %520 = vmatpush.msra.mxu3 %v511_v24 }
 0x123   : > { %v267_v28 = vpop.f32.mrf.mxu0  ;;  %521 = vmatpush.msra.mxu3 %v510_v25 }
 0x124   : > { %v268_v29 = vadd.f32 %v267_v28, %v1059_v49 }
 0x125   : > { %522 = vmatpush.msra.mxu3 %v509_v26 }
 0x126   : > { %v293_v31 = vmax.f32 %v268_v29, 0.0  ;;  %v508_v29 = vld [vmem:[#allocation5 + $0x1e0] sm:$0xff] }
 0x127   : > { %523 = vmatpush.msra.mxu3 %v508_v29 }
 0x128   : > { %366 = vmatmul.f32.gmra.mxu1 %v293_v31  ;;  %v507_v31 = vld [vmem:[#allocation5 + $0x1d8] sm:$0xff] }
 0x129   : > { %524 = vmatpush.msra.mxu3 %v507_v31 }
 0x12b   : > { %v270_v35 = vpop.f32.mrf.mxu0  ;;  %525 = vmatpush.msra.mxu3 %v506_v32 }
 0x12c   : > { %v271_v36 = vadd.f32 %v270_v35, %v1059_v49 }
 0x12d   : > { %526 = vmatpush.msra.mxu3 %v505_v33 }
 0x12e   : > { %v294_v38 = vmax.f32 %v271_v36, 0.0 }
 0x12f   : > { %527 = vmatpush.msra.mxu3 %v504_v34 }
 0x130   : > { %369 = vmatmul.f32.gmra.mxu1 %v294_v38 }
 0x131   : > { %528 = vmatpush.msra.mxu3 %v503_v37 }
 0x133   : > { %v273_v41 = vpop.f32.mrf.mxu0  ;;  %529 = vmatpush.msra.mxu3 %v502_v39 }
 0x134   : > { %v274_v42 = vadd.f32 %v273_v41, %v1059_v49 }
 0x135   : > { %530 = vmatpush.msra.mxu3 %v501_v40 }
 0x136   : > { %v295_v43 = vmax.f32 %v274_v42, 0.0 }
 0x138   : > { %372 = vmatmul.f32.gmra.mxu1 %v295_v43  ;;  %v500_v43 = vld [vmem:[#allocation5 + $0x1a0] sm:$0xff] }
 0x139   : > { %531 = vmatpush.msra.mxu3 %v500_v43 }
 0x13b   : > { %v276_v44 = vpop.f32.mrf.mxu0 }
 0x13c   : > { %v277_v45 = vadd.f32 %v276_v44, %v1059_v49 }
 0x13e   : > { %v296_v46 = vmax.f32 %v277_v45, 0.0  ;;  %v499_v45 = vld [vmem:[#allocation5 + $0x198] sm:$0xff] }
 0x13f   : > { %532 = vmatpush.msra.mxu3 %v499_v45 }
 0x140   : > { %375 = vmatmul.f32.gmra.mxu1 %v296_v46 }
 0x143   : > { %v279_v47 = vpop.f32.mrf.mxu0 }
 0x144   : > { %v280_v48 = vadd.f32 %v279_v47, %v1059_v49 }
 0x146   : > { %v297_v50 = vmax.f32 %v280_v48, 0.0 }
 0x148   : > { %378 = vmatmul.f32.gmra.mxu1 %v297_v50 }
 0x14d   : > { %v334_v53 = vpop.f32.mrf.mxu1 }
 0x14e   : > { %v335_v54 = vadd.f32 %v334_v53, %v1077_v52 }
 0x150   : > { %v382_v55 = vmax.f32 %v335_v54, 0.0  ;;  %v415_v54 = vld [vmem:[#allocation5 + $0x190] sm:$0xff] }
 0x152   : > { %433 = vmatmul.f32.vlgmr.msra.gmra.mxu2 %v382_v55  ;;  %v416_v55 = vperm.slane %v415_v54, 0 }
 0x155   : > { %v337_v56 = vpop.f32.mrf.mxu1 }
 0x156   : > { %v338_v57 = vadd.f32 %v337_v56, %v1077_v52 }
 0x158   : > { %v383_v58 = vmax.f32 %v338_v57, 0.0 }
 0x15a   : > { %436 = vmatmul.f32.gmra.mxu2 %v383_v58 }
 0x15d   : > { %v340_v59 = vpop.f32.mrf.mxu1 }
 0x15e   : > { %v341_v60 = vadd.f32 %v340_v59, %v1077_v52 }
 0x160   : > { %v384_v61 = vmax.f32 %v341_v60, 0.0 }
 0x162   : > { %439 = vmatmul.f32.gmra.mxu2 %v384_v61 }
 0x165   : > { %v343_v49 = vpop.f32.mrf.mxu1 }
 0x166   : > { %v344_v62 = vadd.f32 %v343_v49, %v1077_v52 }
 0x168   : > { %v385_v63 = vmax.f32 %v344_v62, 0.0 }
 0x16a   : > { %442 = vmatmul.f32.gmra.mxu2 %v385_v63 }
 0x16d   : > { %v346_v0 = vpop.f32.mrf.mxu1 }
 0x16e   : > { %v347_v1 = vadd.f32 %v346_v0, %v1077_v52 }
 0x170   : > { %v386_v2 = vmax.f32 %v347_v1, 0.0 }
 0x172   : > { %445 = vmatmul.f32.gmra.mxu2 %v386_v2 }
 0x175   : > { %v349_v3 = vpop.f32.mrf.mxu1 }
 0x176   : > { %v350_v4 = vadd.f32 %v349_v3, %v1077_v52 }
 0x178   : > { %v387_v5 = vmax.f32 %v350_v4, 0.0 }
 0x17a   : > { %448 = vmatmul.f32.gmra.mxu2 %v387_v5 }
 0x17d   : > { %v352_v6 = vpop.f32.mrf.mxu1 }
 0x17e   : > { %v353_v7 = vadd.f32 %v352_v6, %v1077_v52 }
 0x180   : > { %v388_v8 = vmax.f32 %v353_v7, 0.0 }
 0x182   : > { %451 = vmatmul.f32.gmra.mxu2 %v388_v8 }
 0x185   : > { %v355_v9 = vpop.f32.mrf.mxu1 }
 0x186   : > { %v356_v10 = vadd.f32 %v355_v9, %v1077_v52 }
 0x188   : > { %v389_v11 = vmax.f32 %v356_v10, 0.0 }
 0x18a   : > { %454 = vmatmul.f32.gmra.mxu2 %v389_v11 }
 0x18d   : > { %v358_v12 = vpop.f32.mrf.mxu1 }
 0x18e   : > { %v359_v13 = vadd.f32 %v358_v12, %v1077_v52 }
 0x190   : > { %v390_v14 = vmax.f32 %v359_v13, 0.0 }
 0x192   : > { %457 = vmatmul.f32.gmra.mxu2 %v390_v14 }
 0x195   : > { %v361_v15 = vpop.f32.mrf.mxu1 }
 0x196   : > { %v362_v16 = vadd.f32 %v361_v15, %v1077_v52 }
 0x198   : > { %v391_v17 = vmax.f32 %v362_v16, 0.0 }
 0x19a   : > { %460 = vmatmul.f32.gmra.mxu2 %v391_v17 }
 0x19d   : > { %v364_v20 = vpop.f32.mrf.mxu1 }
 0x19e   : > { %v365_v21 = vadd.f32 %v364_v20, %v1077_v52 }
 0x1a0   : > { %v392_v23 = vmax.f32 %v365_v21, 0.0 }
 0x1a2   : > { %463 = vmatmul.f32.gmra.mxu2 %v392_v23 }
 0x1a5   : > { %v367_v27 = vpop.f32.mrf.mxu1 }
 0x1a6   : > { %v368_v28 = vadd.f32 %v367_v27, %v1077_v52 }
 0x1a8   : > { %v393_v30 = vmax.f32 %v368_v28, 0.0 }
 0x1aa   : > { %466 = vmatmul.f32.gmra.mxu2 %v393_v30 }
 0x1ad   : > { %v370_v35 = vpop.f32.mrf.mxu1 }
 0x1ae   : > { %v371_v36 = vadd.f32 %v370_v35, %v1077_v52 }
 0x1b0   : > { %v394_v38 = vmax.f32 %v371_v36, 0.0 }
 0x1b2   : > { %469 = vmatmul.f32.gmra.mxu2 %v394_v38  ;;  %v515_v38 = vld [vmem:[#allocation5 + $0x218] sm:$0xff] }
 0x1b3   : > { %v516_v39 = vperm.slane %v515_v38, 0 }
 0x1b5   : > { %v373_v41 = vpop.f32.mrf.mxu1 }
 0x1b6   : > { %v374_v42 = vadd.f32 %v373_v41, %v1077_v52 }
 0x1b8   : > { %v395_v44 = vmax.f32 %v374_v42, 0.0 }
 0x1ba   : > { %472 = vmatmul.f32.gmra.mxu2 %v395_v44 }
 0x1bd   : > { %v376_v46 = vpop.f32.mrf.mxu1 }
 0x1be   : > { %v377_v47 = vadd.f32 %v376_v46, %v1077_v52 }
 0x1c0   : > { %v396_v48 = vmax.f32 %v377_v47, 0.0 }
 0x1c2   : > { %475 = vmatmul.f32.gmra.mxu2 %v396_v48 }
 0x1c5   : > { %v379_v50 = vpop.f32.mrf.mxu1 }
 0x1c6   : > { %v380_v51 = vadd.f32 %v379_v50, %v1077_v52 }
 0x1c8   : > { %v397_v53 = vmax.f32 %v380_v51, 0.0 }
 0x1ca   : > { %478 = vmatmul.f32.gmra.mxu2 %v397_v53 }
 0x1d5   : > { %v434_v56 = vpop.f32.mrf.mxu2 }
 0x1d6   : > { %v435_v57 = vadd.f32 %v434_v56, %v416_v55 }
 0x1d8   : > { %v482_v58 = vmax.f32 %v435_v57, 0.0 }
 0x1da   : > { %533 = vmatmul.f32.vlgmr.msra.gmra.mxu3 %v482_v58 }
 0x1dd   : > { %v437_v59 = vpop.f32.mrf.mxu2 }
 0x1de   : > { %v438_v60 = vadd.f32 %v437_v59, %v416_v55 }
 0x1e0   : > { %v483_v61 = vmax.f32 %v438_v60, 0.0 }
 0x1e2   : > { %536 = vmatmul.f32.gmra.mxu3 %v483_v61 }
 0x1e5   : > { %v440_v49 = vpop.f32.mrf.mxu2 }
 0x1e6   : > { %v441_v62 = vadd.f32 %v440_v49, %v416_v55 }
 0x1e8   : > { %v484_v63 = vmax.f32 %v441_v62, 0.0 }
 0x1ea   : > { %539 = vmatmul.f32.gmra.mxu3 %v484_v63 }
 0x1ed   : > { %v443_v0 = vpop.f32.mrf.mxu2 }
 0x1ee   : > { %v444_v1 = vadd.f32 %v443_v0, %v416_v55 }
 0x1f0   : > { %v485_v2 = vmax.f32 %v444_v1, 0.0 }
 0x1f2   : > { %542 = vmatmul.f32.gmra.mxu3 %v485_v2 }
 0x1f5   : > { %v446_v52 = vpop.f32.mrf.mxu2 }
 0x1f6   : > { %v447_v3 = vadd.f32 %v446_v52, %v416_v55 }
 0x1f8   : > { %v486_v4 = vmax.f32 %v447_v3, 0.0 }
 0x1fa   : > { %545 = vmatmul.f32.gmra.mxu3 %v486_v4 }
 0x1fd   : > { %v449_v5 = vpop.f32.mrf.mxu2 }
 0x1fe   : > { %v450_v6 = vadd.f32 %v449_v5, %v416_v55 }
 0x200   : > { %v487_v7 = vmax.f32 %v450_v6, 0.0 }
 0x202   : > { %548 = vmatmul.f32.gmra.mxu3 %v487_v7 }
 0x205   : > { %v452_v8 = vpop.f32.mrf.mxu2 }
 0x206   : > { %v453_v9 = vadd.f32 %v452_v8, %v416_v55 }
 0x208   : > { %v488_v10 = vmax.f32 %v453_v9, 0.0 }
 0x20a   : > { %551 = vmatmul.f32.gmra.mxu3 %v488_v10 }
 0x20d   : > { %v455_v11 = vpop.f32.mrf.mxu2 }
 0x20e   : > { %v456_v12 = vadd.f32 %v455_v11, %v416_v55 }
 0x210   : > { %v489_v13 = vmax.f32 %v456_v12, 0.0 }
 0x212   : > { %554 = vmatmul.f32.gmra.mxu3 %v489_v13 }
 0x215   : > { %v458_v14 = vpop.f32.mrf.mxu2 }
 0x216   : > { %v459_v15 = vadd.f32 %v458_v14, %v416_v55 }
 0x218   : > { %v490_v16 = vmax.f32 %v459_v15, 0.0 }
 0x21a   : > { %557 = vmatmul.f32.gmra.mxu3 %v490_v16 }
 0x21d   : > { %v461_v17 = vpop.f32.mrf.mxu2 }
 0x21e   : > { %v462_v18 = vadd.f32 %v461_v17, %v416_v55 }
 0x220   : > { %v491_v19 = vmax.f32 %v462_v18, 0.0 }
 0x222   : > { %560 = vmatmul.f32.gmra.mxu3 %v491_v19 }
 0x225   : > { %v464_v20 = vpop.f32.mrf.mxu2 }
 0x226   : > { %v465_v21 = vadd.f32 %v464_v20, %v416_v55 }
 0x228   : > { %v492_v22 = vmax.f32 %v465_v21, 0.0 }
 0x22a   : > { %563 = vmatmul.f32.gmra.mxu3 %v492_v22 }
 0x22d   : > { %v467_v23 = vpop.f32.mrf.mxu2 }
 0x22e   : > { %v468_v24 = vadd.f32 %v467_v23, %v416_v55 }
 0x230   : > { %v493_v25 = vmax.f32 %v468_v24, 0.0 }
 0x232   : > { %566 = vmatmul.f32.gmra.mxu3 %v493_v25 }
 0x235   : > { %v470_v26 = vpop.f32.mrf.mxu2 }
 0x236   : > { %v471_v27 = vadd.f32 %v470_v26, %v416_v55 }
 0x238   : > { %v494_v28 = vmax.f32 %v471_v27, 0.0 }
 0x23a   : > { %569 = vmatmul.f32.gmra.mxu3 %v494_v28 }
 0x23d   : > { %v473_v29 = vpop.f32.mrf.mxu2 }
 0x23e   : > { %v474_v30 = vadd.f32 %v473_v29, %v416_v55 }
 0x240   : > { %v495_v31 = vmax.f32 %v474_v30, 0.0 }
 0x242   : > { %572 = vmatmul.f32.gmra.mxu3 %v495_v31 }
 0x245   : > { %v476_v32 = vpop.f32.mrf.mxu2 }
 0x246   : > { %v477_v33 = vadd.f32 %v476_v32, %v416_v55 }
 0x248   : > { %v496_v34 = vmax.f32 %v477_v33, 0.0 }
 0x24a   : > { %575 = vmatmul.f32.gmra.mxu3 %v496_v34 }
 0x24d   : > { %v479_v35 = vpop.f32.mrf.mxu2 }
 0x24e   : > { %v480_v36 = vadd.f32 %v479_v35, %v416_v55 }
 0x250   : > { %v497_v37 = vmax.f32 %v480_v36, 0.0 }
 0x252   : > { %578 = vmatmul.f32.gmra.mxu3 %v497_v37 }
 0x25d   : > { %v534_v40 = vpop.f32.mrf.mxu3 }
 0x25e   : > { %v535_v41 = vadd.f32 %v534_v40, %v516_v39 }
 0x260   : > { %582 = vst [vmem:[%s1097_s15] sm:$0xff] %v535_v41 }
 0x265   : > { %v537_v42 = vpop.f32.mrf.mxu3 }
 0x266   : > { %v538_v43 = vadd.f32 %v537_v42, %v516_v39 }
 0x268   : > { %583 = vst [vmem:[%s1097_s15 + $0x8] sm:$0xff] %v538_v43 }
 0x26d   : > { %v540_v44 = vpop.f32.mrf.mxu3 }
 0x26e   : > { %v541_v45 = vadd.f32 %v540_v44, %v516_v39 }
 0x270   : > { %584 = vst [vmem:[%s1097_s15 + $0x10] sm:$0xff] %v541_v45 }
 0x275   : > { %v543_v46 = vpop.f32.mrf.mxu3 }
 0x276   : > { %v544_v47 = vadd.f32 %v543_v46, %v516_v39 }
 0x278   : > { %585 = vst [vmem:[%s1097_s15 + $0x18] sm:$0xff] %v544_v47 }
 0x27d   : > { %v546_v48 = vpop.f32.mrf.mxu3 }
 0x27e   : > { %v547_v50 = vadd.f32 %v546_v48, %v516_v39 }
 0x280   : > { %586 = vst [vmem:[%s1097_s15 + $0x20] sm:$0xff] %v547_v50 }
 0x285   : > { %v549_v51 = vpop.f32.mrf.mxu3 }
 0x286   : > { %v550_v53 = vadd.f32 %v549_v51, %v516_v39 }
 0x288   : > { %587 = vst [vmem:[%s1097_s15 + $0x28] sm:$0xff] %v550_v53 }
 0x28d   : > { %v552_v54 = vpop.f32.mrf.mxu3 }
 0x28e   : > { %v553_v55 = vadd.f32 %v552_v54, %v516_v39 }
 0x290   : > { %588 = vst [vmem:[%s1097_s15 + $0x30] sm:$0xff] %v553_v55 }
 0x295   : > { %v555_v56 = vpop.f32.mrf.mxu3 }
 0x296   : > { %v556_v57 = vadd.f32 %v555_v56, %v516_v39 }
 0x298   : > { %589 = vst [vmem:[%s1097_s15 + $0x38] sm:$0xff] %v556_v57 }
 0x29d   : > { %v558_v58 = vpop.f32.mrf.mxu3 }
 0x29e   : > { %v559_v59 = vadd.f32 %v558_v58, %v516_v39 }
 0x2a0   : > { %590 = vst [vmem:[%s1097_s15 + $0x40] sm:$0xff] %v559_v59 }
 0x2a5   : > { %v561_v60 = vpop.f32.mrf.mxu3 }
 0x2a6   : > { %v562_v61 = vadd.f32 %v561_v60, %v516_v39 }
 0x2a8   : > { %591 = vst [vmem:[%s1097_s15 + $0x48] sm:$0xff] %v562_v61 }
 0x2ad   : > { %v564_v49 = vpop.f32.mrf.mxu3 }
 0x2ae   : > { %v565_v62 = vadd.f32 %v564_v49, %v516_v39 }
 0x2b0   : > { %592 = vst [vmem:[%s1097_s15 + $0x50] sm:$0xff] %v565_v62 }
 0x2b5   : > { %v567_v63 = vpop.f32.mrf.mxu3 }
 0x2b6   : > { %v568_v0 = vadd.f32 %v567_v63, %v516_v39 }
 0x2b8   : > { %593 = vst [vmem:[%s1097_s15 + $0x58] sm:$0xff] %v568_v0 }
 0x2bd   : > { %v570_v1 = vpop.f32.mrf.mxu3 }
 0x2be   : > { %v571_v2 = vadd.f32 %v570_v1, %v516_v39 }
 0x2c0   : > { %594 = vst [vmem:[%s1097_s15 + $0x60] sm:$0xff] %v571_v2 }
 0x2c5   : > { %v573_v52 = vpop.f32.mrf.mxu3 }
 0x2c6   : > { %v574_v3 = vadd.f32 %v573_v52, %v516_v39 }
 0x2c8   : > { %595 = vst [vmem:[%s1097_s15 + $0x68] sm:$0xff] %v574_v3 }
 0x2cd   : > { %v576_v4 = vpop.f32.mrf.mxu3 }
 0x2ce   : > { %v577_v5 = vadd.f32 %v576_v4, %v516_v39 }
 0x2d0   : > { %596 = vst [vmem:[%s1097_s15 + $0x70] sm:$0xff] %v577_v5 }
 0x2d5   : > { %v579_v6 = vpop.f32.mrf.mxu3 }
 0x2d6   : > { %v580_v7 = vadd.f32 %v579_v6, %v516_v39 }
 0x2d8   : > { %597 = vst [vmem:[%s1097_s15 + $0x78] sm:$0xff] %v580_v7 }
 0x2d9   : > { %863 = shalt.err (!%p860_p10)
}
 0x2da   : > { %s911_s5 = smov 128   ;;  %s912_s30 = smov 8  }
 0x2db   : > { %721 = dma.vmem_to_hbm [thread:$0]  (%p997_p3), %s612_s17, 2048, %s614_s18, %s599_s19, %s911_s5, %s911_s5, %s912_s30  }
 0x2dc PF: > { %s628_s6 = sand.u32 1, %s894_s9   ;;  %p1157_p12 = scmp.ge.s32.totalorder %s906_s12, 2 }
 0x2dd   : > { %s629_s7 = scalar_lea.sflag [#allocation4], %s628_s6 }
 0x2de   : > { %p732_p13 = pnand %p1157_p12, %p963_p6 }
 0x2e0   : > { %p733_p0 = pneg %p732_p13 }
 0x2e2   : > { %889 = dma.done.wait (%p733_p0), %s629_s7, 2048  }
 0x2e3   : > { %891 = vsyncadd (%p733_p0), %s629_s7, 4294965248  ;;  %p16_p5 = scmp.ge.s32.totalorder %s981_s23, 4   ;;  %s1158_s9 = smov %s898_s10 }
 0x2e4   : > { %s1159_s10 = smov %s902_s11  ;;  %s1160_s11 = smov %s993_s28 }
 0x2e5   : > { %s1161_s12 = smov %s981_s23  ;;  %18 = sbr.rel (!%p16_p5) target bundleno = 6 (0x6), region = 80 }
 0x2ea   :  { %635 = vsyncpa [#allocation3], 1 }
 0x2eb   :  { %637 = vsyncpa [#allocation3 + $0x1], 1 }
 0x2ec   :  { %638 = vsyncpa [#allocation6], 1 }
 0x2ed   :  { %639 = vsyncpa [#allocation4], 1 }
 0x2ee   :  { %641 = vsyncpa [#allocation4 + $0x1], 1 }

</bundles_post_ra>
